<compile_context>
chip_gen: v7x
topology: tpu7x:2x2x1
jax: 0.10.0
libtpu: 0.0.40
codegen_flags: <defaults>
</compile_context>

<pallas_src>
import numpy as np
import jax
import jax.numpy as jnp
from jax.experimental import pallas as pl
from jax.experimental.pallas import tpu as pltpu

_LANE_CHUNK = 128


def _rdft_matrices(n: int, f_pad: int):
    """Fused real matrices implementing ortho rfft / irfft of a length-n signal.

    Returns ff (2*f_pad, n) f32 with  [X_re; X_im] = ff @ x, and gg (n, 2*f_pad)
    bf16 with  x = gg @ [Y_re; Y_im].  Rows/cols beyond F = n//2+1 are zero
    padding so the re/im halves stay sublane-tile aligned inside the kernel.
    """
    f = n // 2 + 1
    t = np.arange(n)
    k = np.arange(f)
    s = 1.0 / np.sqrt(n)
    ang = 2.0 * np.pi * np.outer(k, t) / n                  # (F, N)
    fr = np.zeros((f_pad, n), np.float32)
    fi = np.zeros((f_pad, n), np.float32)
    fr[:f] = np.cos(ang) * s                                # X_re = Fr @ x
    fi[:f] = -np.sin(ang) * s                               # X_im = Fi @ x
    scale2 = np.full((f,), 2.0)
    scale2[0] = 1.0
    if n % 2 == 0:
        scale2[-1] = 1.0                                    # DC / Nyquist not doubled
    ang2 = 2.0 * np.pi * np.outer(t, k) / n                 # (N, F)
    gr = np.zeros((n, f_pad), np.float32)
    gi = np.zeros((n, f_pad), np.float32)
    gr[:, :f] = np.cos(ang2) * scale2[None, :] * s          # x = Gr @ Y_re + Gi @ Y_im
    gi[:, :f] = -np.sin(ang2) * scale2[None, :] * s
    ff = np.concatenate([fr, fi], axis=0)                   # (2*Fp, N)
    gg = np.concatenate([gr, gi], axis=1)                   # (N, 2*Fp)
    return jnp.asarray(ff, jnp.float32), jnp.asarray(gg, jnp.bfloat16)


def _vmem_capacity_bytes() -> int:
    """Generation-aware VMEM capacity (128 MiB on v5e/v6e, 64 MiB on v7x)."""
    try:
        cap = getattr(pltpu.get_tpu_info(), "vmem_capacity_bytes", None)
        if cap:
            return int(cap)
    except Exception:
        pass
    return 64 * 1024 * 1024                                 # conservative (v7x per-TC)


def _step_vmem_bytes(n: int, f_pad: int, c: int, bb: int, x_itemsize: int) -> int:
    """Approximate per-grid-step VMEM footprint: single-buffered constants,
    double-buffered x/out blocks, and f32 in-kernel intermediates."""
    bbc = bb * c
    const = (4 * (2 * f_pad * n)        # ff (f32)
             + 2 * (2 * f_pad * n)      # gg (bf16)
             + 4 * 4 * bbc              # packed weights
             + 2 * 4 * bb * bbc)        # seg + segt
    blocks = 2 * 2 * x_itemsize * n * bbc                   # x + out, double-buffered
    interm = 4 * bbc * (2 * n + 8 * f_pad)                  # f32 copies + spectral temps
    return const + blocks + interm


def _pick_lane_batch(b, c, n, f_pad, x_itemsize, vmem_budget, target_lanes=512):
    """How many batch elements to stack along the lane axis per grid step."""
    if c >= 128:
        return 1        # lanes already dense -> skip the host-side relayout entirely
    cands = [d for d in range(1, b + 1)
             if b % d == 0 and d * c <= target_lanes
             and _step_vmem_bytes(n, f_pad, c, d, x_itemsize) <= vmem_budget]
    if not cands:
        return 1
    # Prefer: >= 2 grid steps, then an even step count (v7x megacore shards the
    # single "parallel" axis across its two TensorCores), then widest lane tile.
    def score(d):
        g = b // d
        return (g >= 2, g >= 2 and g % 2 == 0, d)
    return max(cands, key=score)


def _asb_kernel(thr_ref, x_ref, ff_ref, gg_ref, w_ref, seg_ref, segt_ref, o_ref):
    f_pad = ff_ref.shape[0] // 2
    n = x_ref.shape[1]
    bbc = x_ref.shape[2]
    bb = seg_ref.shape[0]
    f = n // 2 + 1                                          # true number of rfft bins
    kth = (f - 1) // 2                                      # torch lower-median rank

    x = x_ref[0].astype(jnp.float32)                        # (N, bb*C)

    # ---- rfft (ortho): one fused f32 matmul.  f32 keeps the median / mask
    # decisions bit-robust against the f32 reference (see header note). --------
    spec = jnp.dot(ff_ref[...], x, preferred_element_type=jnp.float32)  # (2Fp, bbC)
    x_re = spec[:f_pad, :]
    x_im = spec[f_pad:, :]

    # ---- per-batch spectral energy & adaptive high-frequency mask ------------
    sq = x_re * x_re + x_im * x_im                          # (Fp, bbC)
    # e_cols[k, b] = sum_c |X[b, k, c]|^2 -- native (M,K)@(K,N) MXU contraction.
    e_cols = jnp.dot(sq, segt_ref[...], preferred_element_type=jnp.float32)  # (Fp, bb)
    e_rows = e_cols.T                                       # (bb, Fp): tiny XLU transpose,
                                                            # bitwise-identical values.

    freq_ok_col = jax.lax.broadcasted_iota(jnp.int32, (f_pad, 1), 0) < f
    freq_ok_row = jax.lax.broadcasted_iota(jnp.int32, (1, f_pad), 1) < f
    inf = jnp.float32(jnp.inf)
    thr = thr_ref[0, 0]

    mask_cols = []
    for b in range(bb):                                     # static, small, unrolled
        ec = jnp.where(freq_ok_col, e_cols[:, b:b + 1], inf)   # (Fp, 1); pads -> +inf
        er = jnp.where(freq_ok_row, e_rows[b:b + 1, :], inf)   # (1, Fp); same values
        # Rank-count lower median (matches torch.median along the freq axis);
        # the pairwise comparison is chunked to 128 lanes to bound temporaries.
        counts = jnp.zeros((f_pad, 1), jnp.float32)
        for j0 in range(0, f_pad, _LANE_CHUNK):
            j1 = min(j0 + _LANE_CHUNK, f_pad)
            counts = counts + jnp.sum((er[:, j0:j1] <= ec).astype(jnp.float32),
                                      axis=1, keepdims=True)
        med = jnp.min(jnp.where(counts >= (kth + 1.0), ec, inf),
                      axis=0, keepdims=True)                # (1, 1)
        # e/(med+eps) > thr  rewritten as  e > thr*(med+eps)  (no divide).
        mask_cols.append((ec > thr * (med + 1e-6)).astype(jnp.float32))
    mask_b = mask_cols[0] if bb == 1 else jnp.concatenate(mask_cols, axis=1)  # (Fp, bb)
    # Expand per-batch mask columns to the lane layout with one tiny MXU matmul
    # instead of bb VPU select+add passes.  (Padded freq rows get mask=1, which
    # is harmless: ff's padded rows and gg's padded columns are exactly zero.)
    mask = jnp.dot(mask_b, seg_ref[...], preferred_element_type=jnp.float32)  # (Fp, bbC)

    # ---- complex weighting:  y = x_fft * (w + mask * w_high) -----------------
    w = w_ref[...].astype(jnp.float32)                      # (4, bbC)
    eff_re = w[0:1, :] + mask * w[2:3, :]
    eff_im = w[1:2, :] + mask * w[3:4, :]
    y_re = x_re * eff_re - x_im * eff_im
    y_im = x_re * eff_im + x_im * eff_re

    # ---- irfft (ortho, n=N): one fused bf16 matmul (f32 accumulate).  Imag
    # parts of DC / Nyquist bins drop out: the matching gg columns are zero.
    y = jnp.concatenate([y_re, y_im], axis=0).astype(jnp.bfloat16)      # (2Fp, bbC)
    out = jnp.dot(gg_ref[...], y, preferred_element_type=jnp.float32)   # (N, bbC)
    o_ref[0] = out.astype(o_ref.dtype)


def adaptive_spectral_block(x, complex_weight, complex_weight_high, threshold_param,
                            lane_batch=None):
    b, n, c = x.shape
    f = n // 2 + 1
    f_pad = -(-f // 8) * 8                                  # round F up to sublane tile
    itemsize = jnp.dtype(x.dtype).itemsize

    vmem_budget = int(_vmem_capacity_bytes() * 0.85)        # leave compiler headroom
    bb = (_pick_lane_batch(b, c, n, f_pad, itemsize, vmem_budget)
          if lane_batch is None else lane_batch)
    g = b // bb
    bbc = bb * c

    ff, gg = _rdft_matrices(n, f_pad)                       # ff: f32, gg: bf16
    w_base = jnp.stack([complex_weight[:, 0], complex_weight[:, 1],
                        complex_weight_high[:, 0], complex_weight_high[:, 1]],
                       axis=0).astype(jnp.float32)          # (4, C)
    w = w_base if bb == 1 else jnp.tile(w_base, (1, bb))    # (4, bb*C), batch-major lanes
    seg_np = np.kron(np.eye(bb, dtype=np.float32), np.ones((1, c), np.float32))
    seg = jnp.asarray(seg_np)                               # (bb, bb*C) 0/1 selector
    segt = jnp.asarray(np.ascontiguousarray(seg_np.T))      # (bb*C, bb)
    thr = jnp.reshape(threshold_param.astype(jnp.float32), (1, 1))

    # Lane-stack bb batch elements only when actually needed (bb > 1); otherwise
    # index the batch axis of the original array directly (no extra HBM passes).
    if bb == 1:
        x2 = x
    else:
        x2 = x.reshape(g, bb, n, c).transpose(0, 2, 1, 3).reshape(g, n, bbc)

    footprint = _step_vmem_bytes(n, f_pad, c, bb, itemsize)
    vmem_limit = int(min(vmem_budget, max(32 * 1024 * 1024, 2 * footprint)))
    # TODO(synk): for N >= ~1024 the resident O(N^2) DFT matrices dominate VMEM;
    # tile the DFT contraction over N-chunks with an extra "arbitrary" grid axis
    # and a VMEM accumulator instead of holding full ff/gg resident.

    dft_flops = 2 * (2 * f_pad) * n * bbc * 2               # rfft + irfft matmuls
    aux_flops = 2 * f_pad * bbc * 2 * bb + 12 * f_pad * bbc # energy/mask matmuls + VPU
    cost = pl.CostEstimate(
        flops=int(g * (dft_flops + aux_flops)),
        transcendentals=0,
        bytes_accessed=int(2 * b * n * c * itemsize + ff.size * 4 + gg.size * 2
                           + (4 + 2 * bb) * bbc * 4),
    )

    def const_spec(shape):                                  # fetched once: single-buffer
        return pl.BlockSpec(shape, lambda i: (0, 0), pipeline_mode=pl.Buffered(1))

    out2 = pl.pallas_call(
        _asb_kernel,
        out_shape=jax.ShapeDtypeStruct((g, n, bbc), x.dtype),
        grid_spec=pltpu.PrefetchScalarGridSpec(
            num_scalar_prefetch=0,
            grid=(g,),                                      # bb batch elems per step
            in_specs=[
                pl.BlockSpec(memory_space=pltpu.MemorySpace.SMEM),   # threshold scalar
                pl.BlockSpec((1, n, bbc), lambda i: (i, 0, 0)),      # activations
                const_spec((2 * f_pad, n)),                          # fused rfft (f32)
                const_spec((n, 2 * f_pad)),                          # fused irfft (bf16)
                const_spec((4, bbc)),                                # packed weights
                const_spec((bb, bbc)),                               # segment rows
                const_spec((bbc, bb)),                               # segment cols
            ],
            out_specs=pl.BlockSpec((1, n, bbc), lambda i: (i, 0, 0)),
        ),
        compiler_params=pltpu.CompilerParams(
            dimension_semantics=("parallel",),
            vmem_limit_bytes=vmem_limit,
        ),
        cost_estimate=cost,
    )(thr, x2, ff, gg, w, seg, segt)

    if bb == 1:
        return out2
    return out2.reshape(g, n, bb, c).transpose(0, 2, 1, 3).reshape(b, n, c)


def _reference(x, complex_weight, complex_weight_high, threshold_param):
    """Plain-JAX reference reproducing the PyTorch forward semantics."""
    b, n, c = x.shape
    xf = x.astype(jnp.float32)
    x_fft = jnp.fft.rfft(xf, axis=1, norm="ortho")          # (B, F, C) complex
    weight = complex_weight[:, 0] + 1j * complex_weight[:, 1]
    x_weighted = x_fft * weight
    energy = jnp.sum(jnp.abs(x_fft) ** 2, axis=-1)          # (B, F)
    fdim = energy.shape[1]
    median = jnp.sort(energy, axis=1)[:, (fdim - 1) // 2][:, None]  # torch lower median
    normalized = energy / (median + 1e-6)
    # Straight-through trick (mask - thr).detach() + thr is gradient-only; the
    # forward value is the hard 0/1 mask.
    mask = (normalized > threshold_param[0]).astype(jnp.float32)[..., None]
    weight_high = complex_weight_high[:, 0] + 1j * complex_weight_high[:, 1]
    x_weighted = x_weighted + (x_fft * mask) * weight_high
    out = jnp.fft.irfft(x_weighted, n=n, axis=1, norm="ortho")
    return out.astype(x.dtype)


if __name__ == "__main__":
    B, N, C = 4, 16, 64                                     # small shapes; dim = C
    key = jax.random.PRNGKey(0)
    k_x, k_w, k_wh, k_t = jax.random.split(key, 4)

    x = jax.random.normal(k_x, (B, N, C), dtype=jnp.float32)
    # Deterministic synthetic parameters (module __init__: trunc_normal std=0.02, rand(1))
    complex_weight = (jax.random.truncated_normal(k_w, -2.0, 2.0, (C, 2)) * 0.02
                      ).astype(jnp.float32)
    complex_weight_high = (jax.random.truncated_normal(k_wh, -2.0, 2.0, (C, 2)) * 0.02
                           ).astype(jnp.float32)
    threshold_param = jax.random.uniform(k_t, (1,), dtype=jnp.float32)

    out = adaptive_spectral_block(x, complex_weight, complex_weight_high, threshold_param)
    out = jax.block_until_ready(out)

    ref = jax.block_until_ready(
        _reference(x, complex_weight, complex_weight_high, threshold_param))

    if not np.allclose(np.asarray(out), np.asarray(ref), atol=2e-3, rtol=2e-2):
        raise AssertionError("Pallas kernel does not match JAX reference")
    print("KERNEL_OK")
</pallas_src>

<mosaic_0001>
module attributes {stable_mosaic.version = 11 : i64} {
  func.func @_asb_kernel(%arg0: i32, %arg1: memref<1x1xf32, #tpu.memory_space<smem>>, %arg2: memref<1x16x128xf32, #tpu.memory_space<vmem>>, %arg3: memref<32x16xf32, #tpu.memory_space<vmem>>, %arg4: memref<16x32xbf16, #tpu.memory_space<vmem>>, %arg5: memref<4x128xf32, #tpu.memory_space<vmem>>, %arg6: memref<2x128xf32, #tpu.memory_space<vmem>>, %arg7: memref<128x2xf32, #tpu.memory_space<vmem>>, %arg8: memref<1x16x128xf32, #tpu.memory_space<vmem>>) attributes {dimension_semantics = [#tpu.dimension_semantics<parallel>], iteration_bounds = array<i64: 2>, scalar_prefetch = 0 : i64, scratch_operands = 0 : i64, tpu.core_type = #tpu.core_type<tc>, window_params = [{transform_indices = @transform_0, window_bounds = array<i64: 1, 1>}, {transform_indices = @transform_1, window_bounds = array<i64: 1, 16, 128>}, {pipeline_mode = #tpu.pipeline_mode<synchronous>, transform_indices = @transform_2, window_bounds = array<i64: 32, 16>}, {pipeline_mode = #tpu.pipeline_mode<synchronous>, transform_indices = @transform_3, window_bounds = array<i64: 16, 32>}, {pipeline_mode = #tpu.pipeline_mode<synchronous>, transform_indices = @transform_4, window_bounds = array<i64: 4, 128>}, {pipeline_mode = #tpu.pipeline_mode<synchronous>, transform_indices = @transform_5, window_bounds = array<i64: 2, 128>}, {pipeline_mode = #tpu.pipeline_mode<synchronous>, transform_indices = @transform_6, window_bounds = array<i64: 128, 2>}, {transform_indices = @transform_7, window_bounds = array<i64: 1, 16, 128>}]} {
    %c0 = arith.constant 0 : index
    %c0_0 = arith.constant 0 : index
    %c0_1 = arith.constant 0 : index
    %0 = vector.load %arg2[%c0, %c0_0, %c0_1] : memref<1x16x128xf32, #tpu.memory_space<vmem>>, vector<1x16x128xf32>
    %1 = vector.shape_cast %0 : vector<1x16x128xf32> to vector<16x128xf32>
    %c0_2 = arith.constant 0 : index
    %c0_3 = arith.constant 0 : index
    %2 = vector.load %arg3[%c0_2, %c0_3] : memref<32x16xf32, #tpu.memory_space<vmem>>, vector<32x16xf32>
    %cst = arith.constant dense<0.000000e+00> : vector<32x128xf32>
    %3 = tpu.matmul %2, %1, %cst {dimension_numbers = #tpu.dot_dimension_numbers<[1], [0], [0], [1], [0, 0, 1, 1], [], []>} : vector<32x16xf32>, vector<16x128xf32>, vector<32x128xf32> -> vector<32x128xf32>
    %4 = vector.extract_strided_slice %3 {offsets = [0, 0], sizes = [16, 128], strides = [1, 1]} : vector<32x128xf32> to vector<16x128xf32>
    %5 = vector.extract_strided_slice %3 {offsets = [16, 0], sizes = [16, 128], strides = [1, 1]} : vector<32x128xf32> to vector<16x128xf32>
    %6 = arith.mulf %4, %4 : vector<16x128xf32>
    %7 = arith.mulf %5, %5 : vector<16x128xf32>
    %8 = arith.addf %6, %7 : vector<16x128xf32>
    %c0_4 = arith.constant 0 : index
    %c0_5 = arith.constant 0 : index
    %9 = vector.load %arg7[%c0_4, %c0_5] : memref<128x2xf32, #tpu.memory_space<vmem>>, vector<128x2xf32>
    %cst_6 = arith.constant dense<0.000000e+00> : vector<16x2xf32>
    %10 = tpu.matmul %8, %9, %cst_6 {dimension_numbers = #tpu.dot_dimension_numbers<[1], [0], [0], [1], [0, 0, 1, 1], [], []>} : vector<16x128xf32>, vector<128x2xf32>, vector<16x2xf32> -> vector<16x2xf32>
    %11 = tpu.transpose %10, [1, 0] : vector<16x2xf32> -> vector<2x16xf32>
    %12 = tpu.iota {dimensions = array<i32: 0>} : vector<16x1xi32>
    %c9_i32 = arith.constant 9 : i32
    %13 = vector.broadcast %c9_i32 : i32 to vector<16x1xi32>
    %14 = arith.cmpi slt, %12, %13 : vector<16x1xi32>
    %15 = tpu.iota {dimensions = array<i32: 1>} : vector<1x16xi32>
    %c9_i32_7 = arith.constant 9 : i32
    %16 = vector.broadcast %c9_i32_7 : i32 to vector<1x16xi32>
    %17 = arith.cmpi slt, %15, %16 : vector<1x16xi32>
    %c0_8 = arith.constant 0 : index
    %c0_9 = arith.constant 0 : index
    %18 = memref.load %arg1[%c0_8, %c0_9] : memref<1x1xf32, #tpu.memory_space<smem>>
    %19 = vector.extract_strided_slice %10 {offsets = [0, 0], sizes = [16, 1], strides = [1, 1]} : vector<16x2xf32> to vector<16x1xf32>
    %cst_10 = arith.constant 0x7F800000 : f32
    %20 = vector.broadcast %cst_10 : f32 to vector<16x1xf32>
    %21 = arith.select %14, %19, %20 : vector<16x1xi1>, vector<16x1xf32>
    %22 = vector.extract_strided_slice %11 {offsets = [0, 0], sizes = [1, 16], strides = [1, 1]} : vector<2x16xf32> to vector<1x16xf32>
    %cst_11 = arith.constant 0x7F800000 : f32
    %23 = vector.broadcast %cst_11 : f32 to vector<1x16xf32>
    %24 = arith.select %17, %22, %23 : vector<1x16xi1>, vector<1x16xf32>
    %cst_12 = arith.constant 0.000000e+00 : f32
    %25 = vector.broadcast %cst_12 : f32 to vector<16x1xf32>
    %26 = vector.broadcast %24 : vector<1x16xf32> to vector<16x16xf32>
    %27 = vector.broadcast %21 : vector<16x1xf32> to vector<16x16xf32>
    %28 = arith.cmpf ole, %26, %27 : vector<16x16xf32>
    %29 = arith.extui %28 : vector<16x16xi1> to vector<16x16xi32>
    %30 = arith.sitofp %29 : vector<16x16xi32> to vector<16x16xf32>
    %cst_13 = arith.constant dense<0.000000e+00> : vector<16xf32>
    %31 = vector.multi_reduction <add>, %30, %cst_13 [1] : vector<16x16xf32> to vector<16xf32>
    %32 = vector.shape_cast %31 : vector<16xf32> to vector<16x1xf32>
    %33 = arith.addf %25, %32 : vector<16x1xf32>
    %cst_14 = arith.constant 5.000000e+00 : f32
    %34 = vector.broadcast %cst_14 : f32 to vector<16x1xf32>
    %35 = arith.cmpf oge, %33, %34 : vector<16x1xf32>
    %cst_15 = arith.constant 0x7F800000 : f32
    %36 = vector.broadcast %cst_15 : f32 to vector<16x1xf32>
    %37 = arith.select %35, %21, %36 : vector<16x1xi1>, vector<16x1xf32>
    %cst_16 = arith.constant dense<0x7F800000> : vector<1xf32>
    %38 = vector.multi_reduction <minimumf>, %37, %cst_16 [0] : vector<16x1xf32> to vector<1xf32>
    %39 = vector.shape_cast %38 : vector<1xf32> to vector<1x1xf32>
    %cst_17 = arith.constant 9.99999997E-7 : f32
    %40 = vector.broadcast %cst_17 : f32 to vector<1x1xf32>
    %41 = arith.addf %39, %40 : vector<1x1xf32>
    %42 = vector.broadcast %18 : f32 to vector<1x1xf32>
    %43 = arith.mulf %42, %41 : vector<1x1xf32>
    %44 = vector.broadcast %43 : vector<1x1xf32> to vector<16x1xf32>
    %45 = arith.cmpf ogt, %21, %44 : vector<16x1xf32>
    %46 = arith.extui %45 : vector<16x1xi1> to vector<16x1xi32>
    %47 = arith.sitofp %46 : vector<16x1xi32> to vector<16x1xf32>
    %48 = vector.extract_strided_slice %10 {offsets = [0, 1], sizes = [16, 1], strides = [1, 1]} : vector<16x2xf32> to vector<16x1xf32>
    %cst_18 = arith.constant 0x7F800000 : f32
    %49 = vector.broadcast %cst_18 : f32 to vector<16x1xf32>
    %50 = arith.select %14, %48, %49 : vector<16x1xi1>, vector<16x1xf32>
    %51 = vector.extract_strided_slice %11 {offsets = [1, 0], sizes = [1, 16], strides = [1, 1]} : vector<2x16xf32> to vector<1x16xf32>
    %cst_19 = arith.constant 0x7F800000 : f32
    %52 = vector.broadcast %cst_19 : f32 to vector<1x16xf32>
    %53 = arith.select %17, %51, %52 : vector<1x16xi1>, vector<1x16xf32>
    %cst_20 = arith.constant 0.000000e+00 : f32
    %54 = vector.broadcast %cst_20 : f32 to vector<16x1xf32>
    %55 = vector.broadcast %53 : vector<1x16xf32> to vector<16x16xf32>
    %56 = vector.broadcast %50 : vector<16x1xf32> to vector<16x16xf32>
    %57 = arith.cmpf ole, %55, %56 : vector<16x16xf32>
    %58 = arith.extui %57 : vector<16x16xi1> to vector<16x16xi32>
    %59 = arith.sitofp %58 : vector<16x16xi32> to vector<16x16xf32>
    %cst_21 = arith.constant dense<0.000000e+00> : vector<16xf32>
    %60 = vector.multi_reduction <add>, %59, %cst_21 [1] : vector<16x16xf32> to vector<16xf32>
    %61 = vector.shape_cast %60 : vector<16xf32> to vector<16x1xf32>
    %62 = arith.addf %54, %61 : vector<16x1xf32>
    %cst_22 = arith.constant 5.000000e+00 : f32
    %63 = vector.broadcast %cst_22 : f32 to vector<16x1xf32>
    %64 = arith.cmpf oge, %62, %63 : vector<16x1xf32>
    %cst_23 = arith.constant 0x7F800000 : f32
    %65 = vector.broadcast %cst_23 : f32 to vector<16x1xf32>
    %66 = arith.select %64, %50, %65 : vector<16x1xi1>, vector<16x1xf32>
    %cst_24 = arith.constant dense<0x7F800000> : vector<1xf32>
    %67 = vector.multi_reduction <minimumf>, %66, %cst_24 [0] : vector<16x1xf32> to vector<1xf32>
    %68 = vector.shape_cast %67 : vector<1xf32> to vector<1x1xf32>
    %cst_25 = arith.constant 9.99999997E-7 : f32
    %69 = vector.broadcast %cst_25 : f32 to vector<1x1xf32>
    %70 = arith.addf %68, %69 : vector<1x1xf32>
    %71 = vector.broadcast %18 : f32 to vector<1x1xf32>
    %72 = arith.mulf %71, %70 : vector<1x1xf32>
    %73 = vector.broadcast %72 : vector<1x1xf32> to vector<16x1xf32>
    %74 = arith.cmpf ogt, %50, %73 : vector<16x1xf32>
    %75 = arith.extui %74 : vector<16x1xi1> to vector<16x1xi32>
    %76 = arith.sitofp %75 : vector<16x1xi32> to vector<16x1xf32>
    %77 = tpu.concatenate %47, %76 in 1 : vector<16x1xf32>, vector<16x1xf32> -> vector<16x2xf32>
    %c0_26 = arith.constant 0 : index
    %c0_27 = arith.constant 0 : index
    %78 = vector.load %arg6[%c0_26, %c0_27] : memref<2x128xf32, #tpu.memory_space<vmem>>, vector<2x128xf32>
    %cst_28 = arith.constant dense<0.000000e+00> : vector<16x128xf32>
    %79 = tpu.matmul %77, %78, %cst_28 {dimension_numbers = #tpu.dot_dimension_numbers<[1], [0], [0], [1], [0, 0, 1, 1], [], []>} : vector<16x2xf32>, vector<2x128xf32>, vector<16x128xf32> -> vector<16x128xf32>
    %c0_29 = arith.constant 0 : index
    %c0_30 = arith.constant 0 : index
    %80 = vector.load %arg5[%c0_29, %c0_30] : memref<4x128xf32, #tpu.memory_space<vmem>>, vector<4x128xf32>
    %81 = vector.extract_strided_slice %80 {offsets = [0, 0], sizes = [1, 128], strides = [1, 1]} : vector<4x128xf32> to vector<1x128xf32>
    %82 = vector.extract_strided_slice %80 {offsets = [2, 0], sizes = [1, 128], strides = [1, 1]} : vector<4x128xf32> to vector<1x128xf32>
    %83 = vector.broadcast %82 : vector<1x128xf32> to vector<16x128xf32>
    %84 = arith.mulf %79, %83 : vector<16x128xf32>
    %85 = vector.broadcast %81 : vector<1x128xf32> to vector<16x128xf32>
    %86 = arith.addf %85, %84 : vector<16x128xf32>
    %87 = vector.extract_strided_slice %80 {offsets = [1, 0], sizes = [1, 128], strides = [1, 1]} : vector<4x128xf32> to vector<1x128xf32>
    %88 = vector.extract_strided_slice %80 {offsets = [3, 0], sizes = [1, 128], strides = [1, 1]} : vector<4x128xf32> to vector<1x128xf32>
    %89 = vector.broadcast %88 : vector<1x128xf32> to vector<16x128xf32>
    %90 = arith.mulf %79, %89 : vector<16x128xf32>
    %91 = vector.broadcast %87 : vector<1x128xf32> to vector<16x128xf32>
    %92 = arith.addf %91, %90 : vector<16x128xf32>
    %93 = arith.mulf %4, %86 : vector<16x128xf32>
    %94 = arith.mulf %5, %92 : vector<16x128xf32>
    %95 = arith.subf %93, %94 : vector<16x128xf32>
    %96 = arith.mulf %4, %92 : vector<16x128xf32>
    %97 = arith.mulf %5, %86 : vector<16x128xf32>
    %98 = arith.addf %96, %97 : vector<16x128xf32>
    %99 = tpu.concatenate %95, %98 in 0 : vector<16x128xf32>, vector<16x128xf32> -> vector<32x128xf32>
    %100 = arith.truncf %99 : vector<32x128xf32> to vector<32x128xbf16>
    %c0_31 = arith.constant 0 : index
    %c0_32 = arith.constant 0 : index
    %101 = vector.load %arg4[%c0_31, %c0_32] : memref<16x32xbf16, #tpu.memory_space<vmem>>, vector<16x32xbf16>
    %cst_33 = arith.constant dense<0.000000e+00> : vector<16x128xf32>
    %102 = tpu.matmul %101, %100, %cst_33 {dimension_numbers = #tpu.dot_dimension_numbers<[1], [0], [0], [1], [0, 0, 1, 1], [], []>} : vector<16x32xbf16>, vector<32x128xbf16>, vector<16x128xf32> -> vector<16x128xf32>
    %c0_34 = arith.constant 0 : index
    %c0_35 = arith.constant 0 : index
    %c0_36 = arith.constant 0 : index
    %103 = vector.load %arg8[%c0_34, %c0_35, %c0_36] : memref<1x16x128xf32, #tpu.memory_space<vmem>>, vector<1x16x128xf32>
    %104 = vector.shape_cast %103 : vector<1x16x128xf32> to vector<16x128xf32>
    %105 = vector.shape_cast %102 : vector<16x128xf32> to vector<1x16x128xf32>
    tpu.vector_store %arg8[%c0_34, %c0_35, %c0_36], %105 {strides = array<i32>} : memref<1x16x128xf32, #tpu.memory_space<vmem>>, vector<1x16x128xf32>,
    return
  }
  func.func @transform_0(%arg0: i32) -> (i32, i32) {
    %c0_i32 = arith.constant 0 : i32
    %c0_i32_0 = arith.constant 0 : i32
    %c0_i32_1 = arith.constant 0 : i32
    return %c0_i32, %c0_i32_0 : i32, i32
  }
  func.func @transform_1(%arg0: i32) -> (i32, i32, i32) {
    %c0_i32 = arith.constant 0 : i32
    %c0_i32_0 = arith.constant 0 : i32
    %c0_i32_1 = arith.constant 0 : i32
    return %arg0, %c0_i32, %c0_i32_0 : i32, i32, i32
  }
  func.func @transform_2(%arg0: i32) -> (i32, i32) {
    %c0_i32 = arith.constant 0 : i32
    %c0_i32_0 = arith.constant 0 : i32
    %c0_i32_1 = arith.constant 0 : i32
    return %c0_i32, %c0_i32_0 : i32, i32
  }
  func.func @transform_3(%arg0: i32) -> (i32, i32) {
    %c0_i32 = arith.constant 0 : i32
    %c0_i32_0 = arith.constant 0 : i32
    %c0_i32_1 = arith.constant 0 : i32
    return %c0_i32, %c0_i32_0 : i32, i32
  }
  func.func @transform_4(%arg0: i32) -> (i32, i32) {
    %c0_i32 = arith.constant 0 : i32
    %c0_i32_0 = arith.constant 0 : i32
    %c0_i32_1 = arith.constant 0 : i32
    return %c0_i32, %c0_i32_0 : i32, i32
  }
  func.func @transform_5(%arg0: i32) -> (i32, i32) {
    %c0_i32 = arith.constant 0 : i32
    %c0_i32_0 = arith.constant 0 : i32
    %c0_i32_1 = arith.constant 0 : i32
    return %c0_i32, %c0_i32_0 : i32, i32
  }
  func.func @transform_6(%arg0: i32) -> (i32, i32) {
    %c0_i32 = arith.constant 0 : i32
    %c0_i32_0 = arith.constant 0 : i32
    %c0_i32_1 = arith.constant 0 : i32
    return %c0_i32, %c0_i32_0 : i32, i32
  }
  func.func @transform_7(%arg0: i32) -> (i32, i32, i32) {
    %c0_i32 = arith.constant 0 : i32
    %c0_i32_0 = arith.constant 0 : i32
    %c0_i32_1 = arith.constant 0 : i32
    return %arg0, %c0_i32, %c0_i32_0 : i32, i32, i32
  }
}

</mosaic_0001>

<bundles_post_ra>
// kernel: tpu_custom_call.1
= control target key start
LH: loop header
LB: loop body
LE: loop exit
PB: predicated region body
PF: predicated region fallthrough
CT: control target
= control target key end

     0   :  { %s1450_s0 = inlined_call_operand.<no memory space> [shape: f32[1,1], index: 0, kind: input, shape index: {}]   ;;  %s1451_s1 = inlined_call_operand.vmem [shape: f32[2,16,128], index: 1, kind: input, shape index: {}]   ;;  %s1452_s2 = inlined_call_operand.vmem [shape: f32[32,16], index: 2, kind: input, shape index: {}]   ;;  %s1453_s3 = inlined_call_operand.vmem [shape: bf16[16,32], index: 3, kind: input, shape index: {}]   ;;  %s1454_s4 = inlined_call_operand.vmem [shape: f32[4,128], index: 4, kind: input, shape index: {}]   ;;  %s1455_s5 = inlined_call_operand.vmem [shape: f32[2,128], index: 5, kind: input, shape index: {}]   ;;  %s1456_s6 = inlined_call_operand.vmem [shape: f32[128,2], index: 6, kind: input, shape index: {}]   ;;  %s1457_s7 = inlined_call_operand.hbm [shape: f32[2,16,128], index: 7, kind: output, shape index: {}]  }
   0x1   :  { %12 = sst [smem:[#allocation2]] %s1450_s0 }
   0x2   :  { %13 = vsyncpa [#allocation4], 0 }
   0x3   :  { %15 = vsyncpa [#allocation4 + $0x1], 0  ;;  %s1199_s26 = smov 0   ;;  %s1201_s27 = smov 0  }
   0x4   :  { %s1203_s28 = smov 0   ;;  %s1205_s29 = smov 0  }
   0x5 LB: > { %s1220_s0 = sadd.s32 4294967295, %s1147_s29   ;;  %s881_s30 = sadd.s32 4294967294, %s1147_s29   ;;  %s1147_s29 = sphi %s1205_s29, %s1463_s29   ;;  %s1143_s28 = sphi %s1203_s28, %s1462_s28   ;;  %s1139_s27 = sphi %s1201_s27, %s1461_s27   ;;  %s1135_s26 = sphi %s1199_s26, %s1460_s26  }
   0x6   : > { %s1224_s8 = sadd.s32 1, %s1147_s29   ;;  %s180_s9 = sadd.s32 1, %s1143_s28 }
   0x7   : > { %s177_s10 = ssub.s32 %s1147_s29, %s1224_s8  ;;  %p190_p0 = scmp.ne.s32.totalorder %s1143_s28, %s1139_s27 }
   0x8   : > { %p178_p1 = scmp.eq.s32.totalorder %s177_s10, 0  ;;  %p191_p2 = scmp.eq.s32.totalorder %s1220_s0, 1 }
   0x9   : > { %p196_p3 = scmp.ne.s32.totalorder %s1139_s27, %s1135_s26  ;;  %p197_p4 = scmp.eq.s32.totalorder %s881_s30, 1 }
   0xa   : > { %s1235_s11 = scalar_select %p178_p1, %s1143_s28, %s180_s9  }
   0xb   : > { %p1237_p5 = por %p191_p2, %p190_p0  ;;  %p1241_p6 = por %p197_p4, %p196_p3 }
   0xc   : > { %p884_p7 = scmp.ge.s32.totalorder %s1147_s29, 1  ;;  %p241_p8 = scmp.lt.s32.totalorder %s1147_s29, 3 }
   0xe   : > { %p242_p9 = pnand %p884_p7, %p241_p8 }
   0xf   : > { %p273_p10 = scmp.lt.s32.totalorder (!%p242_p9), %s1220_s0, 1  ;;  %v281_v0 = vld [vmem:[%s1452_s2] sm:$0xff] (!%p242_p9)  ;;  %vm285_vm0 = vcmask (!%p242_p9), 130048   ;;  %v390_v2 = vld [vmem:[%s1456_s6 + $0x8] sm:$0xff] (!%p242_p9)  ;;  %v391_v4 = vld [vmem:[%s1456_s6 + $0x10] sm:$0xff] (!%p242_p9)  ;;  %v1149_v41 = vmov (!%p242_p9), 1   ;;  %v512_v43 = vlaneseq (!%p242_p9) }
  0x10   : > { %245 = sbr.rel (%p242_p9) target bundleno = 1272 (0x4f8), region = 48  ;;  %946 = vmatprep.mubr.msk.f32.mxu0 (!%p242_p9), %vm285_vm0, %v281_v0  ;;  %v389_v1 = vld [vmem:[%s1456_s6] sm:$0xff] (!%p242_p9)  ;;  %v392_v5 = vld [vmem:[%s1456_s6 + $0x18] sm:$0xff] (!%p242_p9)  ;;  %v394_v8 = vld [vmem:[%s1456_s6 + $0x28] sm:$0xff] (!%p242_p9)  ;;  %1082 = vset.pattern.permute.xlu1 (!%p242_p9), %v1149_v41  ;;  %v1150_v42 = vmov (!%p242_p9), 0   ;;  %v1151_v59 = vmov (!%p242_p9), 0.0  }
  0x11   : > { %v1004_v3 = vpack.c.bf16 (!%p242_p9), %v390_v2, %v389_v1  ;;  %v1008_v6 = vpack.c.bf16 (!%p242_p9), %v392_v5, %v391_v4  ;;  %v393_v7 = vld [vmem:[%s1456_s6 + $0x20] sm:$0xff] (!%p242_p9)  ;;  %v395_v13 = vld [vmem:[%s1456_s6 + $0x30] sm:$0xff] (!%p242_p9)  ;;  %v396_v14 = vld [vmem:[%s1456_s6 + $0x38] sm:$0xff] (!%p242_p9)  ;;  %1081 = vset.pattern.permute.xlu0 (!%p242_p9), %v1150_v42  ;;  %v1332_v44 = vshrl.u32 (!%p242_p9), %v512_v43, 7  ;;  %v518_v50 = vand.u32 (!%p242_p9), 127, %v512_v43  ;;  %s520_s16 = sld [smem:[#allocation2]] (!%p242_p9) }
  0x12   : > { %v1012_v11 = vpack.c.bf16 (!%p242_p9), %v394_v8, %v393_v7  ;;  %v282_v15 = vld [vmem:[%s1452_s2 + $0x8] sm:$0xff] (!%p242_p9)  ;;  %v1016_v16 = vpack.c.bf16 (!%p242_p9), %v396_v14, %v395_v13  ;;  %v283_v17 = vld [vmem:[%s1452_s2 + $0x10] sm:$0xff] (!%p242_p9)  ;;  %v397_v18 = vld [vmem:[%s1456_s6 + $0x40] sm:$0xff] (!%p242_p9)  ;;  %vm633_vm7 = vcmask (!%p242_p9), 1041408   ;;  %vm556_vm8 = vcmask (!%p242_p9), 7168   ;;  %s270_s22 = sand.u32 (!%p242_p9), 1, %s1139_s27  }
  0x13   : > { %1005 = vmatprep.subr.bf16.mxu1 (!%p242_p9), %v1004_v3  ;;  %v398_v19 = vld [vmem:[%s1456_s6 + $0x48] sm:$0xff] (!%p242_p9)  ;;  %v284_v20 = vld [vmem:[%s1452_s2 + $0x18] sm:$0xff] (!%p242_p9)  ;;  %v399_v22 = vld [vmem:[%s1456_s6 + $0x50] sm:$0xff] (!%p242_p9)  ;;  %v514_v45 = vadd.s32 (!%p242_p9), 8, %v1332_v44  ;;  %vm519_vm2 = vcmp.lt.s32.totalorder (!%p242_p9), %v518_v50, 9  ;;  %v526_v52 = vsub.s32 (!%p242_p9), 0, %v1332_v44 }
  0x14   : > { %1007 = vmatpush3.bf16.msra.mxu1 (!%p242_p9), %v1004_v3  ;;  %v1020_v21 = vpack.c.bf16 (!%p242_p9), %v398_v19, %v397_v18  ;;  %v400_v23 = vld [vmem:[%s1456_s6 + $0x58] sm:$0xff] (!%p242_p9)  ;;  %v401_v25 = vld [vmem:[%s1456_s6 + $0x60] sm:$0xff] (!%p242_p9)  ;;  %v402_v26 = vld [vmem:[%s1456_s6 + $0x68] sm:$0xff] (!%p242_p9)  ;;  %v577_v53 = vsub.s32 (!%p242_p9), 1, %v1332_v44  ;;  %vm605_vm12 = vcmask (!%p242_p9), 15368   ;;  %s911_s25 = sshll.u32 (!%p242_p9), %s1220_s0, 8 }
  0x15   : > { %1009 = vmatprep.subr.bf16.mxu1 (!%p242_p9), %v1008_v6  ;;  %v1024_v24 = vpack.c.bf16 (!%p242_p9), %v400_v23, %v399_v22  ;;  %v1028_v27 = vpack.c.bf16 (!%p242_p9), %v402_v26, %v401_v25  ;;  %v403_v28 = vld [vmem:[%s1456_s6 + $0x70] sm:$0xff] (!%p242_p9)  ;;  %v404_v29 = vld [vmem:[%s1456_s6 + $0x78] sm:$0xff] (!%p242_p9)  ;;  %vm516_vm1 = vcmp.lt.s32.totalorder (!%p242_p9), %v514_v45, 9  ;;  %v625_v5 = vld [vmem:[%s1455_s5] sm:$0x3] (!%p242_p9)  ;;  %s1407_s10 = scalar_lea.hbm (!%p242_p9), %s1457_s7, %s911_s25 }
  0x16   : > { %v1032_v30 = vpack.c.bf16 (!%p242_p9), %v404_v29, %v403_v28  ;;  %v712_v50 = vld [vmem:[%s1454_s4] sm:$0xf] (!%p242_p9) }
  0x17   : > { %s274_s20 = scalar_select %p273_p10, %s1220_s0, 1 }
  0x18   : > { %1011 = vmatpush3.bf16.msra.mxu1 %v1008_v6  ;;  %s1153_s0 = smov [#allocation3]  }
  0x19   : > { %s910_s14 = sshll.u32 %s274_s20, 4  ;;  %1013 = vmatprep.subr.bf16.mxu1 %v1012_v11  ;;  %s885_s20 = sshll.u32 %s270_s22, 4 }
  0x1a   : > { %s277_s17 = scalar_lea.vmem %s1451_s1, %s910_s14  ;;  %s272_s23 = scalar_lea.vmem [#allocation3], %s885_s20 }
  0x1b   : > { %v279_v9 = vld [vmem:[%s277_s17] sm:$0xff]  ;;  %v280_v10 = vld [vmem:[%s277_s17 + $0x8] sm:$0xff]  ;;  %s819_s24 = sshll.u32 %s272_s23, 4  ;;  %s1409_s14 = scalar_lea.sflag [#allocation4], %s270_s22  ;;  %s1402_s24 = int_to_ptr.vmem [resolvable:$true] %s819_s24 }
  0x1c   : > { %v1000_v12 = vpack.c.bf16 %v280_v10, %v279_v9  ;;  %1015 = vmatpush3.bf16.msra.mxu1 %v1012_v11  ;;  %s1085_s15 = scalar_lea.vmem %s1402_s24, 256 }
  0x1d   : > { %1017 = vmatprep.subr.bf16.mxu1 %v1016_v16  ;;  %p1086_p11 = scmp.ne.s32.totalorder %s1402_s24, %s1085_s15 }
  0x1e   : > { %1001 = vmatprep.subr.bf16.mxu0 %v1000_v12 }
  0x1f   : > { %1003 = vmatpush3.bf16.msra.mxu0 %v1000_v12  ;;  %p1087_p12 = pnand %p1086_p11, %p1237_p5 }
  0x20   : > { %1019 = vmatpush3.bf16.msra.mxu1 %v1016_v16  ;;  %987 = vmatprep.subr.msk.mxu0 %vm633_vm7, %v625_v5 }
  0x21   : > { %1021 = vmatprep.subr.bf16.mxu1 %v1020_v21  ;;  %p1088_p13 = pneg %p1087_p12 }
  0x22   : > { %947 = vmatmul.mubr.msk.f32.vlgmr.msra.gmra.mrb[0].mxu0 %vm285_vm0, %v282_v15 }
  0x23   : > { %949 = vmatprep.mubr.msk.f32.mxu0 %vm285_vm0, %v283_v17  ;;  %988 = vmatpush3.msk.msra.mxu0 %vm633_vm7, %v625_v5 }
  0x24   : > { %1023 = vmatpush3.bf16.msra.mxu1 %v1020_v21  ;;  %992 = vmatprep.subr.bf16.mxu0 %v1151_v59 }
  0x25   : > { %1025 = vmatprep.subr.bf16.mxu1 %v1024_v24 }
  0x26   : > { %950 = vmatmul.mubr.msk.f32.gmra.mrb[2].mxu0 %vm285_vm0, %v284_v20 }
  0x28   : > { %1027 = vmatpush3.bf16.msra.mxu1 %v1024_v24 }
  0x29   : > { %1029 = vmatprep.subr.bf16.mxu1 %v1028_v27 }
  0x2c   : > { %1031 = vmatpush3.bf16.msra.mxu1 %v1028_v27 }
  0x2d   : > { %1033 = vmatprep.subr.bf16.mxu1 %v1032_v30 }
  0x30   : > { %1035 = vmatpush3.bf16.msra.mxu1 %v1032_v30 }
  0xf5   : > { %v1316_v31 = vpop.f32.mrb[0].mxu0 }
  0xf6   : > { %v1318_v32 = vpop.f32.mrb[1].mxu0  ;;  %v384_v34 = vmul.f32 %v1316_v31, %v1316_v31 }
  0xf7   : > { %v383_v37 = vmul.f32 %v1318_v32, %v1318_v32 }
  0xf9   : > { %v1320_v33 = vpop.f32.mrb[2].mxu0 }
  0xfa   : > { %v386_v35 = vmul.f32 %v1320_v33, %v1320_v33  ;;  %v1326_v36 = vpop.f32.mrb[3].mxu0 }
  0xfb   : > { %v385_v38 = vmul.f32 %v1326_v36, %v1326_v36 }
  0xfc   : > { %v388_v39 = vadd.f32 %v386_v35, %v384_v34  ;;  %v567_v34 = vstv %s520_s16  ;;  %s1089_s16 = sshll.u32 %s1153_s0, 4  ;;  %s1090_s16 = int_to_ptr.vmem [resolvable:$false] %s1089_s16 }
  0xfd   : > { %v387_v40 = vadd.f32 %v385_v38, %v383_v37  ;;  %s1091_s17 = scalar_lea.vmem %s1090_s16, 512  ;;  %p1092_p0 = scmp.lt.s32.totalorder %s1402_s24, %s1090_s16 }
  0xfe   : > { %p1093_p1 = scmp.lt.s32.totalorder %s1091_s17, %s1085_s15 }
  0xff   : > { %984 = vmatprep.mubr.f32.mxu1 %v387_v40 }
 0x100   : > { %985 = vmatmul.mubr.f32.vlgmr.msra.gmra.mrb[0].mxu1 %v388_v39  ;;  %p1094_p2 = por %p1093_p1, %p1092_p0 }
 0x102   : > { %p1095_p3 = pnand %p1094_p2, %p1088_p13 }
 0x1d3   : > { %v986_v46 = vpop.f32.mrb[0].mxu1 }
 0x1d4   : > { %v1335_v47 = vpop.f32.mrb[1].mxu1  ;;  %v1339_v48 = vsel %vm516_vm1, %v986_v46, inf }
 0x1d5   : > { %580 = vperm.xlu1 %1082, %v1335_v47   ;;  %530 = vperm.xlu0 %1081, %v1335_v47  }
 0x1d9   : > { %584 = vperm.xlu1 %1082, %v1339_v48   ;;  %535 = vperm.xlu0 %1081, %v1339_v48  }
 0x1f7   : > { %480 = vxpose.xlu0.b32.start [1/2] (short) (narrow) %v1335_v47, 8 }
 0x1fb   : > { %481 = vxpose.xlu0.b32.end [2/2] (short) (narrow) %v986_v46, 8 }
 0x224   : > { %1083 = vset.pattern.permute.xlu0 %v1149_v41 }
 0x254   : > { %v531_v49 = vpop.permute.xlu0 %530  ;;  %v581_v55 = vpop.permute.xlu1 %580 }
 0x258   : > { %v536_v51 = vpop.permute.xlu0 %535  ;;  %v585_v0 = vpop.permute.xlu1 %584 }
 0x277   : > { %v496_v54 = vpop.trf.xlu0 }
 0x278   : > { %v523_v56 = vsel %vm519_vm2, %v496_v54, inf  ;;  %vm626_vm2 = vcmask 15360  }
 0x279   : > { %v527_v57 = vrot.slane %v523_v56, %v526_v52  ;;  %v578_v58 = vrot.slane %v523_v56, %v577_v53  ;;  %v734_v56 = vrot.slane %v712_v50, %v577_v53 }
 0x27b   : > { %vm539_vm3 = vcmp.le.f32.partialorder %v527_v57, %v536_v51  ;;  %vm538_vm4 = vcmp.le.f32.partialorder %v527_v57, %v531_v49  ;;  %vm587_vm5 = vcmp.le.f32.partialorder %v578_v58, %v581_v55  ;;  %vm588_vm6 = vcmp.le.f32.partialorder %v578_v58, %v585_v0 }
 0x27c   : > { %v893_v60 = vsel %vm539_vm3, 1.0, %v1151_v59  ;;  %v892_v61 = vsel %vm538_vm4, 1.0, %v1151_v59  ;;  %v896_v1 = vsel %vm587_vm5, 1.0, %v1151_v59  ;;  %v897_v3 = vsel %vm588_vm6, 1.0, %v1151_v59 }
 0x27d   : > { %v547_v62 = vsel %vm285_vm0, %v893_v60, 0.0  ;;  %v544_v63 = vsel %vm285_vm0, %v892_v61, 0.0  ;;  %v593_v2 = vsel %vm285_vm0, %v896_v1, 0.0  ;;  %v596_v4 = vsel %vm285_vm0, %v897_v3, 0.0 }
 0x27e   : > { %548 = vadd.xlane.f32.xlu0 %v547_v62  ;;  %545 = vadd.xlane.f32.xlu1 %v544_v63  ;;  %vm1152_vm3 = vmmov 0   ;;  %v722_v55 = vrot.slane %v712_v50, %v526_v52  ;;  %vm758_vm4 = vcmask 261120  }
 0x282   : > { %594 = vadd.xlane.f32.xlu1 %v593_v2 }
 0x286   : > { %597 = vadd.xlane.f32.xlu1 %v596_v4 }
 0x30b   : > { %v549_v6 = vpop.xlane.xlu0 %548  ;;  %v546_v7 = vpop.xlane.xlu1 %545 }
 0x30c   : > { %vm553_vm9 = vcmp.ge.f32.partialorder %v549_v6, 5.0  ;;  %vm552_vm10 = vcmp.ge.f32.partialorder %v546_v7, 5.0 }
 0x30d   : > { %v555_v8 = vsel %vm553_vm9, %v1339_v48, inf  ;;  %v554_v9 = vsel %vm552_vm10, %v1335_v47, inf }
 0x30e   : > { %v558_v10 = vsel %vm556_vm8, %v555_v8, inf  ;;  %v557_v11 = vsel %vm556_vm8, %v554_v9, inf }
 0x30f   : > { %v559_v12 = vmin.f32 %v557_v11, %v558_v10  ;;  %v595_v13 = vpop.xlane.xlu1 %594 }
 0x310   : > { %vm601_vm11 = vcmp.ge.f32.partialorder %v595_v13, 5.0 }
 0x311   : > { %v560_v14 = vrot.slane %v559_v12, 4  ;;  %v603_v16 = vsel %vm601_vm11, %v1335_v47, inf }
 0x312   : > { %v606_v20 = vsel %vm605_vm12, %v603_v16, inf }
 0x313   : > { %v561_v15 = vmin.f32 %v559_v12, %v560_v14  ;;  %v598_v17 = vpop.xlane.xlu1 %597 }
 0x314   : > { %vm602_vm13 = vcmp.ge.f32.partialorder %v598_v17, 5.0 }
 0x315   : > { %v562_v18 = vrot.slane %v561_v15, 2  ;;  %v604_v19 = vsel %vm602_vm13, %v1339_v48, inf }
 0x316   : > { %v607_v21 = vsel %vm605_vm12, %v604_v19, inf }
 0x317   : > { %v563_v22 = vmin.f32 %v561_v15, %v562_v18  ;;  %v608_v23 = vmin.f32 %v606_v20, %v607_v21 }
 0x319   : > { %v564_v24 = vrot.slane %v563_v22, 1  ;;  %v609_v25 = vrot.slane %v608_v23, 4 }
 0x31b   : > { %v565_v26 = vmin.f32 %v563_v22, %v564_v24  ;;  %v610_v27 = vmin.f32 %v608_v23, %v609_v25 }
 0x31d   : > { %v611_v28 = vrot.slane %v610_v27, 2  ;;  %v566_v29 = vadd.f32 1e-06, %v565_v26 }
 0x31f   : > { %v612_v30 = vmin.f32 %v610_v27, %v611_v28  ;;  %v568_v38 = vmul.f32 %v567_v34, %v566_v29 }
 0x321   : > { %v613_v35 = vrot.slane %v612_v30, 1  ;;  %vm569_vm14 = vcmp.gt.f32.partialorder %v1335_v47, %v568_v38  ;;  %vm570_vm15 = vcmp.gt.f32.partialorder %v1339_v48, %v568_v38 }
 0x322   : > { %v894_v41 = vsel %vm569_vm14, 1.0, %v1151_v59  ;;  %v895_v43 = vsel %vm570_vm15, 1.0, %v1151_v59 }
 0x323   : > { %v614_v37 = vmin.f32 %v612_v30, %v613_v35 }
 0x325   : > { %v615_v39 = vadd.f32 1e-06, %v614_v37 }
 0x327   : > { %v616_v40 = vmul.f32 %v615_v39, %v567_v34 }
 0x329   : > { %vm617_vm0 = vcmp.gt.f32.partialorder %v1335_v47, %v616_v40  ;;  %vm618_vm1 = vcmp.gt.f32.partialorder %v1339_v48, %v616_v40  ;;  %v715_v47 = vsub.s32 2, %v1332_v44  ;;  %v727_v48 = vsub.s32 3, %v1332_v44 }
 0x32a   : > { %v898_v42 = vsel %vm617_vm0, 1.0, %v1151_v59  ;;  %v899_v45 = vsel %vm618_vm1, 1.0, %v1151_v59 }
 0x32b   : > { %v623_v46 = vsel %vm556_vm8, %v894_v41, %v898_v42  ;;  %v624_v49 = vsel %vm556_vm8, %v895_v43, %v899_v45  ;;  %v716_v51 = vrot.slane %v712_v50, %v715_v47  ;;  %v728_v54 = vrot.slane %v712_v50, %v727_v48 }
 0x32c   : > { %989 = vmatprep.mubr.msk.f32.mxu0 %vm626_vm2, %v623_v46 }
 0x32d   : > { %990 = vmatmul.mubr.msk.f32.vlgmr.msra.gmra.mrb[4].mxu0 %vm626_vm2, %v624_v49 }
 0x32e   : > { %996 = vmatprep.mubr.msk.bf16.mxu0 %vm1152_vm3, %v1151_v59 }
 0x400   : > { %v991_v57 = vpop.f32.mrb[4].mxu0 }
 0x401   : > { %v718_v58 = vmul.f32 %v991_v57, %v716_v51  ;;  %v730_v60 = vmul.f32 %v991_v57, %v728_v54  ;;  %v703_v61 = vpop.f32.mrb[5].mxu0 }
 0x402   : > { %v717_v62 = vmul.f32 %v716_v51, %v703_v61  ;;  %v729_v63 = vmul.f32 %v728_v54, %v703_v61 }
 0x403   : > { %v724_v0 = vadd.f32 %v722_v55, %v718_v58  ;;  %v736_v1 = vadd.f32 %v734_v56, %v730_v60 }
 0x404   : > { %v723_v2 = vadd.f32 %v722_v55, %v717_v62  ;;  %v735_v3 = vadd.f32 %v734_v56, %v729_v63 }
 0x405   : > { %v738_v4 = vmul.f32 %v1316_v31, %v724_v0  ;;  %v740_v5 = vmul.f32 %v1320_v33, %v736_v1  ;;  %v744_v6 = vmul.f32 %v1316_v31, %v736_v1  ;;  %v746_v52 = vmul.f32 %v1320_v33, %v724_v0  ;;  %v1084_v31 = vld [vmem:[%s1453_s3] sm:$0xff]  }
 0x406   : > { %v737_v44 = vmul.f32 %v723_v2, %v1318_v32  ;;  %v739_v53 = vmul.f32 %v735_v3, %v1326_v36  ;;  %v743_v7 = vmul.f32 %v735_v3, %v1318_v32  ;;  %v745_v8 = vmul.f32 %v723_v2, %v1326_v36 }
 0x407   : > { %v742_v9 = vsub.f32 %v738_v4, %v740_v5  ;;  %v748_v10 = vadd.f32 %v746_v52, %v744_v6 }
 0x408   : > { %v741_v11 = vsub.f32 %v737_v44, %v739_v53  ;;  %v747_v12 = vadd.f32 %v745_v8, %v743_v7 }
 0x40a   : > { %v749_v13 = vpack.c.bf16 %v742_v9, %v741_v11  ;;  %v750_v14 = vpack.c.bf16 %v748_v10, %v747_v12 }
 0x40c   : > { %993 = vmatpush3.bf16.msra.mxu0 %v749_v13 }
 0x40d   : > { %994 = vmatprep.subr.bf16.mxu0 %v1151_v59 }
 0x410   : > { %995 = vmatpush3.bf16.msra.mxu0 %v750_v14 }
 0x413   : > { %997 = vmatmul.mubr.msk.bf16.vlgmr.msra.gmra.mrb[8].mxu0 %vm758_vm4, %v1084_v31 }
 0x4e6   : > { %v796_v32 = vpop.f32.mrb[8].mxu0 }
 0x4e7   : > { %803 = vst [vmem:[%s272_s23] sm:$0xff] %v796_v32  ;;  %v998_v33 = vpop.f32.mrb[9].mxu0 }
 0x4e8   : > { %v799_v36 = vpop.f32.mrb[10].mxu0 }
 0x4e9   : > { %804 = vst [vmem:[%s272_s23 + $0x8] sm:$0xff] %v799_v36  ;;  %v999_v59 = vpop.f32.mrb[11].mxu0 }
 0x4ea   : > { %1098 = shalt.err (!%p1095_p3)
}
 0x4eb   : > { %s1099_s18 = scalar_lea.hbm %s1407_s10, 256  ;;  %s1103_s22 = scalar_lea.hbm %s1457_s7, 512 }
 0x4ec   : > { %p1100_p4 = scmp.ne.s32.totalorder %s1407_s10, %s1099_s18  ;;  %p1104_p9 = scmp.lt.u32.totalorder %s1407_s10, %s1457_s7 }
 0x4ed   : > { %p1105_p10 = scmp.lt.u32.totalorder %s1103_s22, %s1099_s18  ;;  %p1107_p12 = scmp.lt.u32.totalorder %s1099_s18, %s1407_s10 }
 0x4ee   : > { %p1101_p7 = pnand %p1100_p4, %p1237_p5 }
 0x4ef   : > { %p1106_p11 = por %p1105_p10, %p1104_p9 }
 0x4f0   : > { %p1102_p8 = pneg %p1101_p7 }
 0x4f1   : > { %p1108_p13 = por %p1107_p12, %p1106_p11 }
 0x4f3   : > { %p1109_p0 = pnand %p1108_p13, %p1102_p8 }
 0x4f5   : > { %1112 = shalt.err (!%p1109_p0)
}
 0x4f6   : > { %s1154_s25 = smov 128   ;;  %s1155_s30 = smov 8  }
 0x4f7   : > { %1036 = dma.vmem_to_hbm [thread:$0]  (%p1237_p5), %s1402_s24, 256, %s1407_s10, %s1409_s14, %s1154_s25, %s1154_s25, %s1155_s30  }
 0x4f8 PF: > { %p1042_p1 = scmp.ge.s32.totalorder %s1147_s29, 2  ;;  %s834_s9 = sand.u32 1, %s1135_s26  }
 0x4f9   : > { %s835_s15 = scalar_lea.sflag [#allocation4], %s834_s9 }
 0x4fa   : > { %p1039_p2 = pnand %p1042_p1, %p1241_p6 }
 0x4fc   : > { %1130 = dma.done.wait (!%p1039_p2), %s835_s15, 256  }
 0x4fd   : > { %1132 = vsyncadd (!%p1039_p2), %s835_s15, 4294967040  ;;  %p18_p3 = scmp.ge.s32.totalorder %s1224_s8, 4   ;;  %s1460_s26 = smov %s1139_s27 }
 0x4fe   : > { %s1461_s27 = smov %s1143_s28  ;;  %s1462_s28 = smov %s1235_s11 }
 0x4ff   : > { %s1463_s29 = smov %s1224_s8  ;;  %20 = sbr.rel (!%p18_p3) target bundleno = 5 (0x5), region = 83 }
 0x506   :  { %840 = vsyncpa [#allocation4], 1 }
 0x507   :  { %842 = vsyncpa [#allocation4 + $0x1], 1 }

</bundles_post_ra>
